<compile_context>
chip_gen: v5e
topology: v5e:2x2
jax: 0.10.0
libtpu: 0.0.40
codegen_flags: <defaults>
</compile_context>

<pallas_src>
import functools
import math

import jax
import jax.numpy as jnp
from jax.experimental import pallas as pl
from jax.experimental.pallas import tpu as pltpu


def _round_up(a: int, b: int) -> int:
    return ((a + b - 1) // b) * b


def _posemb_kernel(x_ref, w_ref, o_ref):
    # x_ref: (TB, 1)  w_ref: (1, H_pad)  o_ref: (TB, 2*H_pad)
    h = w_ref.shape[-1]                       # static padded half_dim (multiple of 128)
    freqs = x_ref[...] * w_ref[...]           # broadcast -> (TB, H_pad)
    o_ref[:, :h] = jnp.sin(freqs).astype(o_ref.dtype)   # lane-aligned slab write
    o_ref[:, h:] = jnp.cos(freqs).astype(o_ref.dtype)   # lane-aligned slab write


@functools.partial(jax.jit, static_argnums=(1, 2, 3))
def sinusoidal_pos_emb(x, dim: int, block_rows: int = 512, out_dtype=jnp.float32):
    """x: (B,) -> (B, dim) with columns [sin(x*f) | cos(x*f)]."""
    B = x.shape[0]
    half_dim = dim // 2

    # Frequency table (same as torch.exp(arange(half_dim) * -log(10000)/(half_dim-1))).
    scale = math.log(10000.0) / (half_dim - 1)
    freqs = jnp.exp(jnp.arange(half_dim, dtype=jnp.float32) * -scale)

    # Pad frequencies to a lane-dense width and the batch to a whole number of row tiles.
    h_pad = _round_up(half_dim, 128)
    tb = min(block_rows, _round_up(B, 8))
    b_pad = _round_up(B, tb)

    x_p = jnp.pad(x.astype(jnp.float32), (0, b_pad - B)).reshape(b_pad, 1)
    w_p = jnp.pad(freqs, (0, h_pad - half_dim)).reshape(1, h_pad)

    out = pl.pallas_call(
        _posemb_kernel,
        out_shape=jax.ShapeDtypeStruct((b_pad, 2 * h_pad), out_dtype),
        grid=(b_pad // tb,),
        in_specs=[
            pl.BlockSpec((tb, 1), lambda i: (i, 0)),
            pl.BlockSpec((1, h_pad), lambda i: (0, 0)),
        ],
        out_specs=pl.BlockSpec((tb, 2 * h_pad), lambda i: (i, 0)),
        compiler_params=pltpu.CompilerParams(
            dimension_semantics=("parallel",),
        ),
    )(x_p, w_p)

    out = out[:B]
    if h_pad == half_dim:
        return out  # already exactly (B, dim), fully lane-dense
    # Strip the frequency padding: keep the valid sin and cos columns.
    return jnp.concatenate(
        [out[:, :half_dim], out[:, h_pad:h_pad + half_dim]], axis=-1
    )


if __name__ == "__main__":
    key = jax.random.PRNGKey(0)

    dim = 16          # must be even; half_dim = 8
    B = 8

    # Deterministic example timesteps.
    x = jax.random.normal(key, (B,), dtype=jnp.float32) * 10.0

    out = sinusoidal_pos_emb(x, dim)
    out = jax.block_until_ready(out)

    # Plain-JAX reference (mirrors the PyTorch forward).
    half_dim = dim // 2
    emb = math.log(10000.0) / (half_dim - 1)
    emb = jnp.exp(jnp.arange(half_dim, dtype=jnp.float32) * -emb)
    emb = x[:, None] * emb[None, :]
    ref = jnp.concatenate([jnp.sin(emb), jnp.cos(emb)], axis=-1)

    assert out.shape == (B, dim), out.shape
    assert jnp.allclose(out, ref, atol=1e-5, rtol=1e-5)

    print("KERNEL_OK")
</pallas_src>

<mosaic_0001>
module attributes {stable_mosaic.version = 11 : i64} {
  func.func @_posemb_kernel(%arg0: i32, %arg1: memref<8x1xf32, #tpu.memory_space<vmem>>, %arg2: memref<1x128xf32, #tpu.memory_space<vmem>>, %arg3: memref<8x256xf32, #tpu.memory_space<vmem>>) attributes {dimension_semantics = [#tpu.dimension_semantics<parallel>], iteration_bounds = array<i64: 1>, scalar_prefetch = 0 : i64, scratch_operands = 0 : i64, tpu.core_type = #tpu.core_type<tc>, window_params = [{transform_indices = @transform_0, window_bounds = array<i64: 8, 1>}, {pipeline_mode = #tpu.pipeline_mode<synchronous>, transform_indices = @transform_1, window_bounds = array<i64: 1, 128>}, {transform_indices = @transform_2, window_bounds = array<i64: 8, 256>}]} {
    %c0 = arith.constant 0 : index
    %c0_0 = arith.constant 0 : index
    %0 = vector.load %arg1[%c0, %c0_0] : memref<8x1xf32, #tpu.memory_space<vmem>>, vector<8x1xf32>
    %c0_1 = arith.constant 0 : index
    %c0_2 = arith.constant 0 : index
    %1 = vector.load %arg2[%c0_1, %c0_2] : memref<1x128xf32, #tpu.memory_space<vmem>>, vector<1x128xf32>
    %2 = vector.broadcast %0 : vector<8x1xf32> to vector<8x128xf32>
    %3 = vector.broadcast %1 : vector<1x128xf32> to vector<8x128xf32>
    %4 = arith.mulf %2, %3 : vector<8x128xf32>
    %5 = math.sin %4 : vector<8x128xf32>
    %c0_3 = arith.constant 0 : index
    %c0_4 = arith.constant 0 : index
    %6 = vector.load %arg3[%c0_3, %c0_4] : memref<8x256xf32, #tpu.memory_space<vmem>>, vector<8x128xf32>
    tpu.vector_store %arg3[%c0_3, %c0_4], %5 {strides = array<i32>} : memref<8x256xf32, #tpu.memory_space<vmem>>, vector<8x128xf32>,
    %7 = math.cos %4 : vector<8x128xf32>
    %c0_5 = arith.constant 0 : index
    %c128 = arith.constant 128 : index
    %8 = vector.load %arg3[%c0_5, %c128] : memref<8x256xf32, #tpu.memory_space<vmem>>, vector<8x128xf32>
    tpu.vector_store %arg3[%c0_5, %c128], %7 {strides = array<i32>} : memref<8x256xf32, #tpu.memory_space<vmem>>, vector<8x128xf32>,
    return
  }
  func.func @transform_0(%arg0: i32) -> (i32, i32) {
    %c0_i32 = arith.constant 0 : i32
    %c0_i32_0 = arith.constant 0 : i32
    return %arg0, %c0_i32 : i32, i32
  }
  func.func @transform_1(%arg0: i32) -> (i32, i32) {
    %c0_i32 = arith.constant 0 : i32
    %c0_i32_0 = arith.constant 0 : i32
    %c0_i32_1 = arith.constant 0 : i32
    return %c0_i32, %c0_i32_0 : i32, i32
  }
  func.func @transform_2(%arg0: i32) -> (i32, i32) {
    %c0_i32 = arith.constant 0 : i32
    %c0_i32_0 = arith.constant 0 : i32
    return %arg0, %c0_i32 : i32, i32
  }
}

</mosaic_0001>

<bundles_post_ra>
// kernel: sinusoidal_pos_emb.1
= control target key start
LH: loop header
LB: loop body
LE: loop exit
PB: predicated region body
PF: predicated region fallthrough
CT: control target
= control target key end

     0   :  { %v352_v0 = vmov 0   ;;  %v353_v16 = vmov 683565275   ;;  %v354_v18 = vmov 2475754826   ;;  %s447_s0 = inlined_call_operand.vmem [shape: f32[8,1], index: 0, kind: input, shape index: {}]   ;;  %s448_s1 = inlined_call_operand.vmem [shape: f32[1,128], index: 1, kind: input, shape index: {}]   ;;  %s449_s2 = inlined_call_operand.vmem [shape: f32[8,256], index: 2, kind: output, shape index: {}]  }
   0x1   :  { %350 = vset.pattern.permute.xlu0 %v352_v0  ;;  %v11_v1 = vld [vmem:[%s447_s0] sm:$0xff]  ;;  %v355_v21 = vmov 2131351028   ;;  %v356_v24 = vmov 2102212464  }
   0x2   :  { %15 = vperm.xlu0 %350, %v11_v1   ;;  %v351_v2 = vld [vmem:[%s448_s1] ss:$0 sm:$0xff]  ;;  %v357_v27 = vmov 920167782   ;;  %v358_v30 = vmov 1326507024  }
  0x74   :  { %v16_v3 = vpop.permute.xlu0 %15 }
  0x75   :  { %v381_v4 = vmul.f32 %v351_v2, %v16_v3 }
  0x77   :  { %v25_v5 = vand.u32 2139095040, %v381_v4  ;;  %v22_v8 = vand.u32 2147483647, %v381_v4  ;;  %vm24_vm12 = vcmp.lt.s32.totalorder %v381_v4, 0 }
  0x79   :  { %v26_v6 = vshrl.u32 %v25_v5, 23  ;;  %v29_v10 = vand.u32 8388607, %v22_v8  ;;  %vm23_vm13 = vcmp.le.f32.partialorder %v22_v8, 0.7853982 }
  0x7b   :  { %v337_v7 = vadd.s32 4294967169, %v26_v6  ;;  %v30_v14 = vor.u32 8388608, %v29_v10 }
  0x7d   :  { %v32_v9 = vadd.s32 1, %v337_v7  ;;  %v398_v37 = vshll.u32 %v30_v14, 8 }
  0x7f   :  { %vm33_vm0 = vcmp.gt.s32.totalorder %v32_v9, 0  ;;  %v71_v46 = vand.u32 65535, %v398_v37  ;;  %v72_v47 = vshrl.u32 %v398_v37, 16 }
  0x80   :  { %v34_v11 = vsel %vm33_vm0, %v32_v9, 0 }
  0x81   :  { %v36_v12 = vand.u32 31, %v34_v11  ;;  %v389_v15 = vshrl.u32 %v34_v11, 5 }
  0x83   :  { %v387_v13 = vsub.s32 32, %v36_v12  ;;  %v39_v17 = vshll.u32 %v353_v16, %v36_v12  ;;  %v42_v19 = vshll.u32 %v354_v18, %v36_v12  ;;  %v45_v23 = vshll.u32 %v355_v21, %v36_v12 }
  0x84   :  { %v48_v26 = vshll.u32 %v356_v24, %v36_v12  ;;  %v51_v29 = vshll.u32 %v357_v27, %v36_v12  ;;  %vm54_vm1 = vcmp.lt.s32.totalorder %v389_v15, 1  ;;  %vm57_vm2 = vcmp.lt.s32.totalorder %v389_v15, 4 }
  0x85   :  { %v40_v20 = vshrl.u32 %v354_v18, %v387_v13  ;;  %v43_v22 = vshrl.u32 %v355_v21, %v387_v13  ;;  %v46_v25 = vshrl.u32 %v356_v24, %v387_v13  ;;  %v49_v28 = vshrl.u32 %v357_v27, %v387_v13 }
  0x86   :  { %v52_v31 = vshrl.u32 %v358_v30, %v387_v13  ;;  %vm56_vm3 = vcmp.lt.s32.totalorder %v389_v15, 3  ;;  %vm55_vm4 = vcmp.lt.s32.totalorder %v389_v15, 2  ;;  %v38_v11 = vshrl.u32 %v353_v16, %v387_v13 }
  0x87   :  { %v41_v32 = vor.u32 %v40_v20, %v39_v17  ;;  %v44_v33 = vor.u32 %v43_v22, %v42_v19  ;;  %v47_v34 = vor.u32 %v46_v25, %v45_v23  ;;  %v50_v35 = vor.u32 %v49_v28, %v48_v26 }
  0x88   :  { %v53_v36 = vor.u32 %v52_v31, %v51_v29 }
  0x89   :  { %v62_v38 = vsel %vm54_vm1, %v41_v32, %v44_v33  ;;  %v66_v39 = vsel %vm54_vm1, %v44_v33, %v47_v34  ;;  %v63_v40 = vsel %vm57_vm2, %v50_v35, 920167782  ;;  %v59_v7 = vsel %vm57_vm2, %v47_v34, 2102212464 }
  0x8a   :  { %v67_v41 = vsel %vm57_vm2, %v53_v36, 1326507024  ;;  %v64_v42 = vsel %vm56_vm3, %v47_v34, %v63_v40  ;;  %v58_v20 = vsel %vm54_vm1, %v38_v11, %v41_v32  ;;  %v60_v21 = vsel %vm56_vm3, %v44_v33, %v59_v7 }
  0x8b   :  { %v68_v43 = vsel %vm56_vm3, %v50_v35, %v67_v41  ;;  %v65_v44 = vsel %vm55_vm4, %v62_v38, %v64_v42  ;;  %v61_v13 = vsel %vm55_vm4, %v58_v20, %v60_v21 }
  0x8c   :  { %v69_v45 = vsel %vm55_vm4, %v66_v39, %v68_v43  ;;  %v95_v50 = vand.u32 65535, %v65_v44  ;;  %v96_v51 = vshrl.u32 %v65_v44, 16  ;;  %v115_v28 = vmul.u32 %v398_v37, %v61_v13 }
  0x8d   :  { %v73_v48 = vand.u32 65535, %v69_v45  ;;  %v74_v49 = vshrl.u32 %v69_v45, 16  ;;  %vm165_vm4 = vweird.f32 %v381_v4 }
  0x8e   :  { %v98_v54 = vmul.u32 %v96_v51, %v71_v46  ;;  %v99_v55 = vmul.u32 %v95_v50, %v72_v47  ;;  %v97_v59 = vmul.u32 %v95_v50, %v71_v46  ;;  %v100_v63 = vmul.u32 %v96_v51, %v72_v47 }
  0x8f   :  { %v76_v52 = vmul.u32 %v74_v49, %v71_v46  ;;  %v77_v53 = vmul.u32 %v73_v48, %v72_v47  ;;  %v75_v56 = vmul.u32 %v73_v48, %v71_v46  ;;  %v78_v58 = vmul.u32 %v74_v49, %v72_v47 }
  0x90   :  { %v101_v60 = vshll.u32 %v98_v54, 16  ;;  %v103_v2 = vshll.u32 %v99_v55, 16  ;;  %v102_v18 = vshrl.u32 %v98_v54, 16  ;;  %v104_v24 = vshrl.u32 %v99_v55, 16 }
  0x91   :  { %v79_v57 = vshll.u32 %v76_v52, 16  ;;  %v81_v61 = vshll.u32 %v77_v53, 16  ;;  %v80_v12 = vshrl.u32 %v76_v52, 16  ;;  %v82_v22 = vshrl.u32 %v77_v53, 16 }
  0x92   :  { %vm105_vm6 = vc.u32 %v97_v59, %v101_v60  ;;  %v107_v3 = vadd.s32 %v101_v60, %v97_v59 }
  0x93   :  { %vm83_vm5 = vc.u32 %v75_v56, %v79_v57  ;;  %v85_v62 = vadd.s32 %v79_v57, %v75_v56  ;;  %v106_v6 = vsel %vm105_vm6, 1, %v352_v0 }
  0x94   :  { %v84_v1 = vsel %vm83_vm5, 1, %v352_v0  ;;  %v108_v10 = vadd.s32 %v106_v6, %v100_v63  ;;  %vm109_vm8 = vc.u32 %v107_v3, %v103_v2  ;;  %v111_v27 = vadd.s32 %v107_v3, %v103_v2 }
  0x95   :  { %v86_v5 = vadd.s32 %v84_v1, %v78_v58  ;;  %vm87_vm7 = vc.u32 %v85_v62, %v81_v61  ;;  %v110_v17 = vsel %vm109_vm8, 1, %v352_v0 }
  0x96   :  { %v88_v9 = vsel %vm87_vm7, 1, %v352_v0  ;;  %v112_v19 = vadd.s32 %v110_v17, %v108_v10 }
  0x97   :  { %v90_v14 = vadd.s32 %v88_v9, %v86_v5 }
  0x98   :  { %v113_v25 = vadd.s32 %v112_v19, %v102_v18 }
  0x99   :  { %v91_v23 = vadd.s32 %v90_v14, %v80_v12 }
  0x9a   :  { %v114_v16 = vadd.s32 %v113_v25, %v104_v24 }
  0x9b   :  { %v92_v26 = vadd.s32 %v91_v23, %v82_v22 }
  0x9c   :  { %v118_v0 = vadd.s32 1, %v114_v16 }
  0x9d   :  { %vm117_vm9 = vc.u32 %v92_v26, %v111_v27  ;;  %v116_v15 = vadd.s32 %v111_v27, %v92_v26 }
  0x9e   :  { %v119_v29 = vsel %vm117_vm9, %v118_v0, %v114_v16 }
  0x9f   :  { %v120_v30 = vadd.s32 %v119_v29, %v115_v28 }
  0xa1   :  { %v121_v31 = vadd.s32 536870912, %v120_v30 }
  0xa3   :  { %v122_v32 = vshrl.u32 %v121_v31, 30 }
  0xa5   :  { %v123_v34 = vshll.u32 %v122_v32, 30  ;;  %v146_v53 = vsub.s32 4, %v122_v32 }
  0xa7   :  { %v124_v33 = vsub.s32 %v120_v30, %v123_v34  ;;  %v147_v58 = vsel %vm24_vm12, %v146_v53, %v122_v32 }
  0xa8   :  { %v149_v61 = vsel %vm23_vm13, 0, %v147_v58 }
  0xa9   :  { %vm125_vm10 = vcmp.lt.s32.totalorder %v124_v33, 0  ;;  %v126_v35 = vsub.s32 0, %v124_v33  ;;  %v166_v3 = vadd.s32 3, %v149_v61  ;;  %v322_v9 = vand.u32 3, %v149_v61 }
  0xab   :  { %v127_v36 = vsel %vm125_vm10, %v126_v35, %v124_v33  ;;  %v167_v10 = vand.u32 3, %v166_v3  ;;  %vm323_vm14 = vcmp.lt.s32.totalorder %v322_v9, 2  ;;  %vm324_vm15 = vcmp.eq.s32.totalorder %v322_v9, 0 }
  0xac   :  { %v128_v38 = vclz %v127_v36  ;;  %vm327_vm3 = vcmp.eq.s32.totalorder %v322_v9, 2 }
  0xad   :  { %vm168_vm0 = vcmp.lt.s32.totalorder %v167_v10, 2  ;;  %vm169_vm1 = vcmp.eq.s32.totalorder %v167_v10, 0  ;;  %vm172_vm2 = vcmp.eq.s32.totalorder %v167_v10, 2 }
  0xae   :  { %v338_v39 = vadd.s32 4294967294, %v128_v38 }
  0xb0   :  { %vm339_vm11 = vcmp.lt.s32.totalorder %v338_v39, 0 }
  0xb1   :  { %v131_v40 = vsel %vm339_vm11, 0, %v338_v39 }
  0xb2   :  { %v132_v41 = vsub.s32 32, %v131_v40  ;;  %v136_v42 = vsub.s32 4294967266, %v131_v40  ;;  %v133_v43 = vshll.u32 %v124_v33, %v131_v40 }
  0xb4   :  { %v134_v44 = vshrl.u32 %v116_v15, %v132_v41  ;;  %v137_v45 = vadd.s32 127, %v136_v42 }
  0xb6   :  { %v135_v37 = vor.u32 %v134_v44, %v133_v43  ;;  %v138_v46 = vshll.u32 %v137_v45, 23 }
  0xb8   :  { %v139_v47 = vor.u32 4788187, %v138_v46  ;;  %v142_v49 = vcvt.s32.f32 %v135_v37 }
  0xba   :  { %v140_v48 = vand.u32 2147483647, %v139_v47 }
  0xbc   :  { %v143_v50 = vmul.f32 %v142_v49, %v140_v48 }
  0xbe   :  { %v144_v51 = vxor.u32 2147483648, %v143_v50 }
  0xc0   :  { %v145_v52 = vsel %vm24_vm12, %v144_v51, %v143_v50 }
  0xc1   :  { %v148_v54 = vsel %vm23_vm13, %v381_v4, %v145_v52 }
  0xc2   :  { %v150_v55 = vmul.f32 %v148_v54, %v148_v54 }
  0xc4   :  { %v151_v56 = vmul.f32 -0.001358992, %v150_v55  ;;  %v158_v57 = vmul.f32 -0.00019511016, %v150_v55 }
  0xc6   :  { %v152_v59 = vadd.f32 0.041655596, %v151_v56  ;;  %v159_v60 = vadd.f32 0.008332121, %v158_v57 }
  0xc8   :  { %v153_v62 = vmul.f32 %v152_v59, %v150_v55  ;;  %v160_v63 = vmul.f32 %v159_v60, %v150_v55 }
  0xca   :  { %v154_v1 = vadd.f32 -0.4999988, %v153_v62  ;;  %v161_v2 = vadd.f32 -0.16666654, %v160_v63 }
  0xcc   :  { %v155_v5 = vmul.f32 %v154_v1, %v150_v55  ;;  %v162_v6 = vmul.f32 %v161_v2, %v150_v55 }
  0xce   :  { %v156_v7 = vadd.f32 1.0, %v155_v5  ;;  %v163_v8 = vadd.f32 1.0, %v162_v6 }
  0xd0   :  { %v164_v11 = vmul.f32 %v163_v8, %v148_v54  ;;  %v173_v12 = vxor.u32 2147483648, %v156_v7 }
  0xd2   :  { %v170_v14 = vxor.u32 2147483648, %v164_v11  ;;  %v174_v18 = vsel %vm172_vm2, %v173_v12, %v164_v11  ;;  %v329_v20 = vsel %vm327_vm3, %v173_v12, %v164_v11 }
  0xd4   :  { %v171_v17 = vsel %vm169_vm1, %v156_v7, %v170_v14  ;;  %v326_v19 = vsel %vm324_vm15, %v156_v7, %v170_v14 }
  0xd5   :  { %v175_v21 = vsel %vm168_vm0, %v171_v17, %v174_v18  ;;  %v330_v22 = vsel %vm323_vm14, %v326_v19, %v329_v20 }
  0xd6   :  { %v176_v23 = vsel %vm165_vm4, nan, %v175_v21  ;;  %v331_v24 = vsel %vm165_vm4, nan, %v330_v22 }
  0xd7   :  { %177 = vst [vmem:[%s449_s2] sm:$0xff] %v176_v23 }
  0xd8   :  { %332 = vst [vmem:[%s449_s2 + $0x8] sm:$0xff] %v331_v24 }

</bundles_post_ra>
